<compile_context>
chip_gen: v7x
topology: tpu7x:2x2x1
jax: 0.10.0
libtpu: 0.0.40
codegen_flags: <defaults>
</compile_context>

<pallas_src>
import jax
import jax.numpy as jnp
from jax import lax
from jax.experimental import pallas as pl
from jax.experimental.pallas import tpu as pltpu


def _eq_mlp_kernel(node_ref, coord_ref, w1t_ref, b1_ref, w2a_ref, b2a_ref,
                   e_ref, wcs_ref, out_ref):
    """One grid step = one block of Bt batch elements.

    node_ref  : [Bt*N, D]    rows of the Bt batches, flattened (matmul dtype)
    coord_ref : [Bt, S, N*3] lane-dense coords (native memory order)
    w1t_ref   : [D, P], b1_ref: [1, P]   node_proj layer-1 (pre-transposed)
    w2a_ref   : [P, S], b2a_ref: [1, S]  fused layer-2 + attn_proj
    e_ref     : [N, N*3]     0/1 expansion matrix, E[n, 3n + c] = 1
    wcs_ref   : [S] (SMEM)   column sums of coord_proj weight
    out_ref   : [Bt, S, N*3] lane-dense output block
    """
    Bt, S, NC = coord_ref.shape
    N = e_ref.shape[0]

    # ---- node path: fused matmul chain over all Bt*N rows (MXU). ----
    h = jnp.dot(node_ref[...], w1t_ref[...],
                preferred_element_type=jnp.float32) + b1_ref[...]
    h = h * jax.nn.sigmoid(h)                                    # SiLU (f32)
    q = jnp.dot(h.astype(w2a_ref.dtype), w2a_ref[...],
                preferred_element_type=jnp.float32) + b2a_ref[...]   # [Bt*N, S]

    # ---- coord path: s_proj[b, nc] = sum_s coord[b, s, nc] * wc_sum[s]. ----
    # Pure VPU scalar-broadcast FMAs over S slabs (no MXU/XLU, no reshapes).
    coord = coord_ref[...].astype(jnp.float32)                   # [Bt, S, NC]
    s_proj = coord[:, 0, :] * wcs_ref[0]
    for s in range(1, S):
        s_proj = s_proj + coord[:, s, :] * wcs_ref[s]            # [Bt, NC]

    # ---- combine: out[b, s, 3n+c] = q[b*N+n, s] * s_proj[b, 3n+c]. ----
    # One small MXU dot per batch element expands q from per-node values to
    # the interleaved (n, c) lane layout: q_rep[s, nc] = q[n(nc), s].  Every
    # column of E sums to 1, so the bias already inside q is carried through
    # exactly.  Then one dense [S, N*3] store per batch element.
    e = e_ref[...]
    dn = (((0,), (0,)), ((), ()))          # contract the node (row) dim of both
    for b in range(Bt):
        q_b = q[b * N:(b + 1) * N, :].astype(e.dtype)            # [N, S]
        q_rep = lax.dot_general(q_b, e, dn,
                                preferred_element_type=jnp.float32)  # [S, NC]
        out_ref[b, :, :] = (q_rep * s_proj[b:b + 1, :]).astype(out_ref.dtype)


def _vmem_capacity_bytes():
    try:
        return int(pltpu.get_tpu_info().vmem_capacity_bytes)
    except Exception:
        return None


def _round_up(x, m):
    return ((x + m - 1) // m) * m


def _pick_batch_block(B, N, S, D, C, *, itemsize=4, max_unroll=8):
    """Largest Bt that (a) fits a conservative double-buffered VMEM budget,
    (b) keeps >= 2 parallel grid steps when B >= 2 (v7x: 2 TensorCores),
    (c) keeps the unrolled per-b combine loop short, and (d) keeps the node
    block sublane-aligned — else fall back to the whole-batch escape hatch."""
    cap_bytes = _vmem_capacity_bytes()
    budget = min((cap_bytes or 128 * 1024 * 1024) // 4, 32 * 1024 * 1024)
    lanes_nc = _round_up(N * C, 128)
    lanes_d = _round_up(D, 128)
    per_b = 2 * (2 * _round_up(S, 8) * lanes_nc
                 + _round_up(N, 8) * lanes_d) * itemsize      # 2x = double buf
    cap = max(1, budget // max(per_b, 1))
    cap = min(cap, B, max_unroll)
    if B >= 2:
        cap = min(cap, max(1, B // 2))     # keep >= 2 parallel steps for v7x
    for bt in range(cap, 0, -1):
        if B % bt == 0 and (bt == B or (bt * N) % 8 == 0):
            return bt
    return B


def equivariant_mlp(coord_sets, node_feats, params, *, block_b=None,
                    matmul_dtype=None):
    """coord_sets: [B, S, N, 3], node_feats: [B, N, D] -> [B, S, N, 3]."""
    B, S, N, C = coord_sets.shape
    _, _, D = node_feats.shape
    P = params["w1"].shape[0]
    NC = N * C

    if matmul_dtype is None:
        # bf16 MXU operands (f32 accumulate) only when inputs are already
        # bf16; keeps the f32 path exact and the VPU path f32 (v5e-safe).
        matmul_dtype = (jnp.bfloat16 if node_feats.dtype == jnp.bfloat16
                        else jnp.float32)

    Bt = _pick_batch_block(B, N, S, D, C) if block_b is None else block_b
    assert B % Bt == 0, (B, Bt)

    # ---- one-time weight prep (tiny; fused by XLA, HIGHEST precision). ----
    f32, hp = jnp.float32, lax.Precision.HIGHEST
    w1t = params["w1"].T.astype(matmul_dtype)                          # [D, P]
    b1 = params["b1"].reshape(1, P).astype(f32)                        # [1, P]
    wat = params["wa"].T.astype(f32)                                   # [P, S]
    w2a = jnp.matmul(params["w2"].T.astype(f32), wat,
                     precision=hp).astype(matmul_dtype)                # [P, S]
    b2a = jnp.matmul(params["b2"].reshape(1, P).astype(f32), wat,
                     precision=hp)                                     # [1, S]
    wcs = jnp.sum(params["wc"].astype(f32), axis=0)                    # [S]
    # 0/1 expansion matrix: E[n, C*n + c] = 1 (per-node -> interleaved lanes).
    e_mat = jnp.repeat(jnp.eye(N, dtype=f32), C, axis=1).astype(matmul_dtype)

    # Contiguous (free) reshapes only — no wrapper transposes of activations.
    node_flat = node_feats.reshape(B * N, D).astype(matmul_dtype)
    coord_flat = coord_sets.reshape(B, S, NC)

    def full_spec(shape):
        zeros = (0,) * len(shape)
        return pl.BlockSpec(shape, lambda i: zeros)

    vmem_cap = _vmem_capacity_bytes()
    cp_kwargs = dict(dimension_semantics=("parallel",))
    if vmem_cap is not None:
        cp_kwargs["vmem_limit_bytes"] = int(min(vmem_cap // 2, 64 * 1024 * 1024))

    out_flat = pl.pallas_call(
        _eq_mlp_kernel,
        out_shape=jax.ShapeDtypeStruct((B, S, NC), coord_sets.dtype),
        grid=(B // Bt,),
        in_specs=[
            pl.BlockSpec((Bt * N, D), lambda i: (i, 0)),           # node rows
            pl.BlockSpec((Bt, S, NC), lambda i: (i, 0, 0)),        # coords
            full_spec((D, P)),                                     # W1^T
            full_spec((1, P)),                                     # b1
            full_spec((P, S)),                                     # W2^T Wa^T
            full_spec((1, S)),                                     # b2 Wa^T
            full_spec((N, NC)),                                    # expansion E
            pl.BlockSpec(memory_space=pltpu.MemorySpace.SMEM),     # wc_sum
        ],
        out_specs=pl.BlockSpec((Bt, S, NC), lambda i: (i, 0, 0)),
        compiler_params=pltpu.CompilerParams(**cp_kwargs),
    )(node_flat, coord_flat, w1t, b1, w2a, b2a, e_mat, wcs)

    return out_flat.reshape(B, S, N, C)


def ref_forward(coord_sets, node_feats, p):
    """Pure-JAX reference mirroring the PyTorch forward op-for-op."""
    hp = lax.Precision.HIGHEST
    h = jnp.dot(node_feats, p["w1"].T, precision=hp) + p["b1"]
    h = h * jax.nn.sigmoid(h)
    inv = (jnp.dot(h, p["w2"].T, precision=hp) + p["b2"])[:, None]     # [B,1,N,P]
    coordT = jnp.transpose(coord_sets, (0, 3, 2, 1))                   # [B,3,N,S]
    proj = jnp.einsum("bcns,ps->bcnp", coordT, p["wc"], precision=hp)  # [B,3,N,P]
    attn = (inv[..., :, None] * proj[..., None, :]).sum(-1)            # [B,3,N,P]
    out = jnp.einsum("bcnp,sp->bcns", attn, p["wa"], precision=hp)     # [B,3,N,S]
    return jnp.transpose(out, (0, 3, 2, 1))                            # [B,S,N,3]


if __name__ == "__main__":
    # Shapes implied by the module: d_model=32, n_coord_sets=4,
    # proj_sets defaults to n_coord_sets, batch=2, n_nodes=8.
    B, S, N, D = 2, 4, 8, 32
    P = S  # proj_sets default

    key = jax.random.PRNGKey(0)
    ks = jax.random.split(key, 8)
    params = {
        "w1": jax.random.normal(ks[0], (P, D), jnp.float32) * 0.1,
        "b1": jax.random.normal(ks[1], (P,), jnp.float32) * 0.1,
        "w2": jax.random.normal(ks[2], (P, P), jnp.float32) * 0.1,
        "b2": jax.random.normal(ks[3], (P,), jnp.float32) * 0.1,
        "wc": jax.random.normal(ks[4], (P, S), jnp.float32) * 0.1,  # coord_proj (no bias)
        "wa": jax.random.normal(ks[5], (S, P), jnp.float32) * 0.1,  # attn_proj (no bias)
    }
    coord_sets = jax.random.normal(ks[6], (B, S, N, 3), jnp.float32)
    node_feats = jax.random.normal(ks[7], (B, N, D), jnp.float32)

    out = equivariant_mlp(coord_sets, node_feats, params)
    out = jax.block_until_ready(out)

    ref = ref_forward(coord_sets, node_feats, params)
    assert out.shape == (B, S, N, 3), out.shape
    assert jnp.allclose(out, ref, rtol=1e-3, atol=1e-3), (
        float(jnp.max(jnp.abs(out - ref))))
    print("KERNEL_OK")
</pallas_src>

<mosaic_0001>
module attributes {stable_mosaic.version = 11 : i64} {
  func.func @_eq_mlp_kernel(%arg0: i32, %arg1: memref<8x32xf32, #tpu.memory_space<vmem>>, %arg2: memref<1x4x24xf32, #tpu.memory_space<vmem>>, %arg3: memref<32x4xf32, #tpu.memory_space<vmem>>, %arg4: memref<1x4xf32, #tpu.memory_space<vmem>>, %arg5: memref<4x4xf32, #tpu.memory_space<vmem>>, %arg6: memref<1x4xf32, #tpu.memory_space<vmem>>, %arg7: memref<8x24xf32, #tpu.memory_space<vmem>>, %arg8: memref<4xf32, #tpu.memory_space<smem>>, %arg9: memref<1x4x24xf32, #tpu.memory_space<vmem>>) attributes {dimension_semantics = [#tpu.dimension_semantics<parallel>], iteration_bounds = array<i64: 2>, scalar_prefetch = 0 : i64, scratch_operands = 0 : i64, tpu.core_type = #tpu.core_type<tc>, window_params = [{transform_indices = @transform_0, window_bounds = array<i64: 8, 32>}, {transform_indices = @transform_1, window_bounds = array<i64: 1, 4, 24>}, {pipeline_mode = #tpu.pipeline_mode<synchronous>, transform_indices = @transform_2, window_bounds = array<i64: 32, 4>}, {pipeline_mode = #tpu.pipeline_mode<synchronous>, transform_indices = @transform_3, window_bounds = array<i64: 1, 4>}, {pipeline_mode = #tpu.pipeline_mode<synchronous>, transform_indices = @transform_4, window_bounds = array<i64: 4, 4>}, {pipeline_mode = #tpu.pipeline_mode<synchronous>, transform_indices = @transform_5, window_bounds = array<i64: 1, 4>}, {pipeline_mode = #tpu.pipeline_mode<synchronous>, transform_indices = @transform_6, window_bounds = array<i64: 8, 24>}, {transform_indices = @transform_7, window_bounds = array<i64: 4>}, {transform_indices = @transform_8, window_bounds = array<i64: 1, 4, 24>}]} {
    %c0 = arith.constant 0 : index
    %c0_0 = arith.constant 0 : index
    %0 = vector.load %arg1[%c0, %c0_0] : memref<8x32xf32, #tpu.memory_space<vmem>>, vector<8x32xf32>
    %c0_1 = arith.constant 0 : index
    %c0_2 = arith.constant 0 : index
    %1 = vector.load %arg3[%c0_1, %c0_2] : memref<32x4xf32, #tpu.memory_space<vmem>>, vector<32x4xf32>
    %cst = arith.constant dense<0.000000e+00> : vector<8x4xf32>
    %2 = tpu.matmul %0, %1, %cst {dimension_numbers = #tpu.dot_dimension_numbers<[1], [0], [0], [1], [0, 0, 1, 1], [], []>} : vector<8x32xf32>, vector<32x4xf32>, vector<8x4xf32> -> vector<8x4xf32>
    %c0_3 = arith.constant 0 : index
    %c0_4 = arith.constant 0 : index
    %3 = vector.load %arg4[%c0_3, %c0_4] : memref<1x4xf32, #tpu.memory_space<vmem>>, vector<1x4xf32>
    %4 = vector.broadcast %3 : vector<1x4xf32> to vector<8x4xf32>
    %5 = arith.addf %2, %4 : vector<8x4xf32>
    %6 = arith.negf %5 : vector<8x4xf32>
    %7 = math.exp %6 : vector<8x4xf32>
    %cst_5 = arith.constant 1.000000e+00 : f32
    %8 = vector.broadcast %cst_5 : f32 to vector<8x4xf32>
    %9 = arith.addf %8, %7 : vector<8x4xf32>
    %10 = arith.divf %8, %9 : vector<8x4xf32>
    %11 = arith.mulf %5, %10 : vector<8x4xf32>
    %c0_6 = arith.constant 0 : index
    %c0_7 = arith.constant 0 : index
    %12 = vector.load %arg5[%c0_6, %c0_7] : memref<4x4xf32, #tpu.memory_space<vmem>>, vector<4x4xf32>
    %cst_8 = arith.constant dense<0.000000e+00> : vector<8x4xf32>
    %13 = tpu.matmul %11, %12, %cst_8 {dimension_numbers = #tpu.dot_dimension_numbers<[1], [0], [0], [1], [0, 0, 1, 1], [], []>} : vector<8x4xf32>, vector<4x4xf32>, vector<8x4xf32> -> vector<8x4xf32>
    %c0_9 = arith.constant 0 : index
    %c0_10 = arith.constant 0 : index
    %14 = vector.load %arg6[%c0_9, %c0_10] : memref<1x4xf32, #tpu.memory_space<vmem>>, vector<1x4xf32>
    %15 = vector.broadcast %14 : vector<1x4xf32> to vector<8x4xf32>
    %16 = arith.addf %13, %15 : vector<8x4xf32>
    %c0_11 = arith.constant 0 : index
    %c0_12 = arith.constant 0 : index
    %c0_13 = arith.constant 0 : index
    %17 = vector.load %arg2[%c0_11, %c0_12, %c0_13] : memref<1x4x24xf32, #tpu.memory_space<vmem>>, vector<1x4x24xf32>
    %18 = vector.extract_strided_slice %17 {offsets = [0, 0, 0], sizes = [1, 1, 24], strides = [1, 1, 1]} : vector<1x4x24xf32> to vector<1x1x24xf32>
    %19 = vector.shape_cast %18 : vector<1x1x24xf32> to vector<1x24xf32>
    %c0_14 = arith.constant 0 : index
    %20 = memref.load %arg8[%c0_14] : memref<4xf32, #tpu.memory_space<smem>>
    %21 = vector.broadcast %20 : f32 to vector<1x24xf32>
    %22 = arith.mulf %19, %21 : vector<1x24xf32>
    %23 = vector.extract_strided_slice %17 {offsets = [0, 1, 0], sizes = [1, 1, 24], strides = [1, 1, 1]} : vector<1x4x24xf32> to vector<1x1x24xf32>
    %24 = vector.shape_cast %23 : vector<1x1x24xf32> to vector<1x24xf32>
    %c1 = arith.constant 1 : index
    %25 = memref.load %arg8[%c1] : memref<4xf32, #tpu.memory_space<smem>>
    %26 = vector.broadcast %25 : f32 to vector<1x24xf32>
    %27 = arith.mulf %24, %26 : vector<1x24xf32>
    %28 = arith.addf %22, %27 : vector<1x24xf32>
    %29 = vector.extract_strided_slice %17 {offsets = [0, 2, 0], sizes = [1, 1, 24], strides = [1, 1, 1]} : vector<1x4x24xf32> to vector<1x1x24xf32>
    %30 = vector.shape_cast %29 : vector<1x1x24xf32> to vector<1x24xf32>
    %c2 = arith.constant 2 : index
    %31 = memref.load %arg8[%c2] : memref<4xf32, #tpu.memory_space<smem>>
    %32 = vector.broadcast %31 : f32 to vector<1x24xf32>
    %33 = arith.mulf %30, %32 : vector<1x24xf32>
    %34 = arith.addf %28, %33 : vector<1x24xf32>
    %35 = vector.extract_strided_slice %17 {offsets = [0, 3, 0], sizes = [1, 1, 24], strides = [1, 1, 1]} : vector<1x4x24xf32> to vector<1x1x24xf32>
    %36 = vector.shape_cast %35 : vector<1x1x24xf32> to vector<1x24xf32>
    %c3 = arith.constant 3 : index
    %37 = memref.load %arg8[%c3] : memref<4xf32, #tpu.memory_space<smem>>
    %38 = vector.broadcast %37 : f32 to vector<1x24xf32>
    %39 = arith.mulf %36, %38 : vector<1x24xf32>
    %40 = arith.addf %34, %39 : vector<1x24xf32>
    %c0_15 = arith.constant 0 : index
    %c0_16 = arith.constant 0 : index
    %41 = vector.load %arg7[%c0_15, %c0_16] : memref<8x24xf32, #tpu.memory_space<vmem>>, vector<8x24xf32>
    %cst_17 = arith.constant dense<0.000000e+00> : vector<4x24xf32>
    %42 = tpu.matmul %16, %41, %cst_17 {dimension_numbers = #tpu.dot_dimension_numbers<[0], [0], [1], [1], [0, 1, 1, 1], [], []>} : vector<8x4xf32>, vector<8x24xf32>, vector<4x24xf32> -> vector<4x24xf32>
    %43 = vector.broadcast %40 : vector<1x24xf32> to vector<4x24xf32>
    %44 = arith.mulf %42, %43 : vector<4x24xf32>
    %c0_18 = arith.constant 0 : index
    %c0_19 = arith.constant 0 : index
    %c0_20 = arith.constant 0 : index
    %45 = vector.load %arg9[%c0_18, %c0_19, %c0_20] : memref<1x4x24xf32, #tpu.memory_space<vmem>>, vector<1x4x24xf32>
    %46 = vector.shape_cast %45 : vector<1x4x24xf32> to vector<4x24xf32>
    %47 = vector.shape_cast %44 : vector<4x24xf32> to vector<1x4x24xf32>
    tpu.vector_store %arg9[%c0_18, %c0_19, %c0_20], %47 {strides = array<i32>} : memref<1x4x24xf32, #tpu.memory_space<vmem>>, vector<1x4x24xf32>,
    return
  }
  func.func @transform_0(%arg0: i32) -> (i32, i32) {
    %c0_i32 = arith.constant 0 : i32
    %c0_i32_0 = arith.constant 0 : i32
    return %arg0, %c0_i32 : i32, i32
  }
  func.func @transform_1(%arg0: i32) -> (i32, i32, i32) {
    %c0_i32 = arith.constant 0 : i32
    %c0_i32_0 = arith.constant 0 : i32
    %c0_i32_1 = arith.constant 0 : i32
    return %arg0, %c0_i32, %c0_i32_0 : i32, i32, i32
  }
  func.func @transform_2(%arg0: i32) -> (i32, i32) {
    %c0_i32 = arith.constant 0 : i32
    %c0_i32_0 = arith.constant 0 : i32
    %c0_i32_1 = arith.constant 0 : i32
    return %c0_i32, %c0_i32_0 : i32, i32
  }
  func.func @transform_3(%arg0: i32) -> (i32, i32) {
    %c0_i32 = arith.constant 0 : i32
    %c0_i32_0 = arith.constant 0 : i32
    %c0_i32_1 = arith.constant 0 : i32
    return %c0_i32, %c0_i32_0 : i32, i32
  }
  func.func @transform_4(%arg0: i32) -> (i32, i32) {
    %c0_i32 = arith.constant 0 : i32
    %c0_i32_0 = arith.constant 0 : i32
    %c0_i32_1 = arith.constant 0 : i32
    return %c0_i32, %c0_i32_0 : i32, i32
  }
  func.func @transform_5(%arg0: i32) -> (i32, i32) {
    %c0_i32 = arith.constant 0 : i32
    %c0_i32_0 = arith.constant 0 : i32
    %c0_i32_1 = arith.constant 0 : i32
    return %c0_i32, %c0_i32_0 : i32, i32
  }
  func.func @transform_6(%arg0: i32) -> (i32, i32) {
    %c0_i32 = arith.constant 0 : i32
    %c0_i32_0 = arith.constant 0 : i32
    %c0_i32_1 = arith.constant 0 : i32
    return %c0_i32, %c0_i32_0 : i32, i32
  }
  func.func @transform_7(%arg0: i32) -> i32 {
    %c0_i32 = arith.constant 0 : i32
    %c0_i32_0 = arith.constant 0 : i32
    return %c0_i32 : i32
  }
  func.func @transform_8(%arg0: i32) -> (i32, i32, i32) {
    %c0_i32 = arith.constant 0 : i32
    %c0_i32_0 = arith.constant 0 : i32
    %c0_i32_1 = arith.constant 0 : i32
    return %arg0, %c0_i32, %c0_i32_0 : i32, i32, i32
  }
}

</mosaic_0001>

<bundles_post_ra>
// kernel: tpu_custom_call.1
= control target key start
LH: loop header
LB: loop body
LE: loop exit
PB: predicated region body
PF: predicated region fallthrough
CT: control target
= control target key end

     0   :  { %13 = vsyncpa [#allocation4], 0  ;;  %s1148_s0 = inlined_call_operand.vmem [shape: f32[16,32], index: 0, kind: input, shape index: {}]   ;;  %s1149_s1 = inlined_call_operand.vmem [shape: f32[2,4,24], index: 1, kind: input, shape index: {}]   ;;  %s1150_s2 = inlined_call_operand.vmem [shape: f32[32,4], index: 2, kind: input, shape index: {}]   ;;  %s1151_s3 = inlined_call_operand.vmem [shape: f32[1,4], index: 3, kind: input, shape index: {}]   ;;  %s1152_s4 = inlined_call_operand.vmem [shape: f32[4,4], index: 4, kind: input, shape index: {}]   ;;  %s1153_s5 = inlined_call_operand.vmem [shape: f32[1,4], index: 5, kind: input, shape index: {}]   ;;  %s1154_s6 = inlined_call_operand.vmem [shape: f32[8,24], index: 6, kind: input, shape index: {}]   ;;  %s1155_s7 = inlined_call_operand.vmem [shape: f32[4], index: 7, kind: input, shape index: {}]   ;;  %s1156_s8 = inlined_call_operand.hbm [shape: f32[2,4,24], index: 8, kind: output, shape index: {}]  }
   0x1   :  { %14 = vsyncpa [#allocation3], 0 }
   0x2   :  { %16 = vsyncpa [#allocation3 + $0x1], 0  ;;  %s996_s27 = smov 0   ;;  %s998_s28 = smov 0  }
   0x3   :  { %s1000_s29 = smov 0   ;;  %s1002_s30 = smov 0  }
   0x4 LB: > { %s1017_s9 = sadd.s32 4294967295, %s944_s30   ;;  %s747_s10 = sadd.s32 4294967294, %s944_s30   ;;  %s944_s30 = sphi %s1002_s30, %s1163_s30   ;;  %s940_s29 = sphi %s1000_s29, %s1162_s29   ;;  %s936_s28 = sphi %s998_s28, %s1161_s28   ;;  %s932_s27 = sphi %s996_s27, %s1160_s27  }
   0x5   : > { %s1021_s11 = sadd.s32 1, %s944_s30   ;;  %s207_s12 = sadd.s32 1, %s940_s29 }
   0x6   : > { %s204_s13 = ssub.s32 %s944_s30, %s1021_s11  ;;  %p217_p0 = scmp.ne.s32.totalorder %s940_s29, %s936_s28 }
   0x7   : > { %p205_p1 = scmp.eq.s32.totalorder %s204_s13, 0  ;;  %p218_p2 = scmp.eq.s32.totalorder %s1017_s9, 1 }
   0x8   : > { %p223_p3 = scmp.ne.s32.totalorder %s936_s28, %s932_s27  ;;  %p224_p4 = scmp.eq.s32.totalorder %s747_s10, 1 }
   0x9   : > { %s1032_s14 = scalar_select %p205_p1, %s940_s29, %s207_s12  }
   0xa   : > { %p1034_p5 = por %p218_p2, %p217_p0  ;;  %p1038_p6 = por %p224_p4, %p223_p3 }
   0xb   : > { %p748_p7 = scmp.ge.s32.totalorder %s944_s30, 1  ;;  %p231_p8 = scmp.lt.s32.totalorder %s944_s30, 3 }
   0xc   : > { %p820_p9 = scmp.eq.s32.totalorder %s1017_s9, 0  ;;  %s259_s20 = sshll.u32 %s1155_s7, 4  ;;  %s260_s20 = int_to_ptr.vmem [resolvable:$true] %s259_s20 }
   0xd   : > { %p1045_p10 = pnand %p748_p7, %p231_p8  ;;  %s863_s21 = scalar_lea.vmem %s260_s20, 16 }
   0xe   : > { %p864_p13 = scmp.ne.s32.totalorder %s260_s20, %s863_s21  ;;  %p871_p3 = scmp.lt.s32.totalorder %s260_s20, %s260_s20 }
   0xf   : > { %p812_p11 = pneg %p1045_p10  ;;  %p872_p4 = scmp.lt.s32.totalorder %s863_s21, %s863_s21 }
  0x11   : > { %p813_p12 = pnand %p820_p9, %p812_p11  ;;  %p873_p7 = por %p872_p4, %p871_p3 }
  0x13   : > { %p865_p0 = pneg %p813_p12 }
  0x15   : > { %p866_p1 = pnand %p865_p0, %p864_p13 }
  0x17   : > { %p867_p2 = pneg %p866_p1 }
  0x19   : > { %p874_p8 = pnand %p873_p7, %p867_p2 }
  0x1b   : > { %877 = shalt.err (!%p874_p8)
}
  0x1c   : > { %s946_s22 = smov [#allocation2]   ;;  %286 = sbr.rel (%p1045_p10) target bundleno = 861 (0x35d), region = 52 }
  0x1d   : > { %815 = dma.vmem_to_smem (!%p813_p12), %s260_s20, 16, %s946_s22, [#allocation4]  }
  0x23   : > { %923 = dma.done.wait (%p820_p9), [#allocation4], 16  }
  0x24   : > { %925 = vsyncadd (%p820_p9), [#allocation4], 4294967280 }
  0x25   : > { %292 = sfence }
  0x26   : > { %v333_v0 = vld [vmem:[%s1150_s2] sm:$0xff]  ;;  %v334_v1 = vld [vmem:[%s1150_s2 + $0x8] sm:$0xff]  ;;  %v335_v2 = vld [vmem:[%s1150_s2 + $0x10] sm:$0xff]  ;;  %v947_v3 = vmov 0.0|0.0   ;;  %vm948_vm0 = vmmov 0   ;;  %v949_v6 = vmov 0.0   ;;  %v643_v37 = vlaneseq }
  0x27   : > { %800 = vmatprep.subr.bf16.mxu0 %v947_v3  ;;  %v801_v4 = vpack.c.bf16 %v334_v1, %v333_v0  ;;  %v336_v5 = vld [vmem:[%s1150_s2 + $0x18] sm:$0xff]  ;;  %787 = vmatprep.mubr.msk.f32.mxu0 %vm948_vm0, %v949_v6  ;;  %p324_p9 = scmp.lt.s32.totalorder %s1017_s9, 1  ;;  %vm344_vm1 = vcmask 261120   ;;  %v425_v9 = vld [vmem:[%s1152_s4] sm:$0xf]  ;;  %vm437_vm2 = vcmask 1043456  }
  0x28   : > { %790 = vmatprep.subr.mxu1 %v949_v6  ;;  %792 = vmatprep.mubr.msk.f32.mxu1 %vm948_vm0, %v949_v6  ;;  %v804_v7 = vpack.c.bf16 %v336_v5, %v335_v2  ;;  %v756_v10 = vld [vmem:[%s1151_s3] ss:$0 sm:$0xff]  ;;  %vm433_vm3 = vcmask 31744   ;;  %vm569_vm4 = vcmask 64512   ;;  %s512_s21 = sld [smem:[#allocation2]]  ;;  %s764_s26 = sld [smem:[#allocation2 + $0x3]] }
  0x29   : > { %802 = vmatpush3.bf16.msra.mxu0 %v801_v4  ;;  %s1078_s18 = scalar_select %p324_p9, %s1017_s9, 1  ;;  %791 = vmatpush3.msk.msra.mxu1 %vm437_vm2, %v425_v9  ;;  %v536_v19 = vld [vmem:[%s1154_s6] sm:$0xff]  ;;  %v644_v40 = vshrl.u32 %v643_v37, 7  ;;  %vm648_vm5 = vcmask 191488  }
  0x2a   : > { %803 = vmatprep.subr.bf16.mxu0 %v947_v3  ;;  %795 = vmatprep.subr.mxu1 %v949_v6  ;;  %v759_v20 = vld [vmem:[%s1153_s5] ss:$0 sm:$0xff]  ;;  %s767_s12 = sshll.u32 %s1017_s9, 6  ;;  %s950_s9 = smov [#allocation5]  }
  0x2b   : > { %s754_s19 = sshll.u32 %s1078_s18, 3  ;;  %s755_s20 = sshll.u32 %s1078_s18, 2  ;;  %v645_v42 = vsub.s32 0, %v644_v40 }
  0x2c   : > { %s327_s22 = scalar_lea.vmem %s1148_s0, %s754_s19  ;;  %s762_s19 = sld [smem:[#allocation2 + $0x1]] }
  0x2d   : > { %805 = vmatpush3.bf16.msra.mxu0 %v804_v7  ;;  %v332_v8 = vld [vmem:[%s327_s22] sm:$0xff]  ;;  %s763_s22 = sld [smem:[#allocation2 + $0x2]]  ;;  %s331_s25 = scalar_lea.vmem %s1149_s1, %s755_s20 }
  0x2e   : > { %v511_v25 = vld [vmem:[%s331_s25] sm:$0xf]  ;;  %v513_v28 = vstv %s512_s21  ;;  %v530_v33 = vstv %s764_s26  ;;  %s321_s18 = sand.u32 1, %s936_s28   ;;  %s1106_s21 = scalar_lea.hbm %s1156_s8, %s767_s12 }
  0x2f   : > { %v514_v30 = vmul.f32 %v513_v28, %v511_v25  ;;  %v531_v36 = vmul.f32 %v530_v33, %v511_v25  ;;  %s753_s10 = sshll.u32 %s321_s18, 2  ;;  %s882_s24 = sshll.u32 %s950_s9, 4  ;;  %s883_s24 = int_to_ptr.vmem [resolvable:$false] %s882_s24 }
  0x30   : > { %788 = vmatmul.mubr.msk.f32.vlgmr.msra.gmra.mrb[0].mxu0 %vm344_vm1, %v332_v8  ;;  %s323_s13 = scalar_lea.vmem [#allocation5], %s753_s10  ;;  %s884_s25 = scalar_lea.vmem %s883_s24, 128 }
  0x31   : > { %v533_v39 = vrot.slane %v531_v36, 3  ;;  %s664_s17 = sshll.u32 %s323_s13, 4  ;;  %s1108_s17 = int_to_ptr.vmem [resolvable:$true] %s664_s17 }
  0x32   : > { %v516_v26 = vstv %s762_s19  ;;  %s878_s23 = scalar_lea.vmem %s1108_s17, 64  ;;  %p885_p13 = scmp.lt.s32.totalorder %s1108_s17, %s883_s24 }
  0x33   : > { %v517_v27 = vmul.f32 %v516_v26, %v511_v25  ;;  %v523_v29 = vstv %s763_s22  ;;  %s651_s22 = scalar_lea.sflag [#allocation3], %s321_s18  ;;  %p879_p10 = scmp.ne.s32.totalorder %s1108_s17, %s878_s23 }
  0x34   : > { %v524_v32 = vmul.f32 %v523_v29, %v511_v25  ;;  %p886_p0 = scmp.lt.s32.totalorder %s884_s25, %s878_s23 }
  0x35   : > { %v519_v31 = vrot.slane %v517_v27, 1  ;;  %p880_p11 = pnand %p879_p10, %p1034_p5 }
  0x36   : > { %v526_v35 = vrot.slane %v524_v32, 2  ;;  %p887_p1 = por %p886_p0, %p885_p13 }
  0x37   : > { %v521_v34 = vadd.f32 %v519_v31, %v514_v30  ;;  %p881_p12 = pneg %p880_p11 }
  0x39   : > { %v528_v38 = vadd.f32 %v526_v35, %v521_v34  ;;  %p888_p2 = pnand %p887_p1, %p881_p12 }
  0x3b   : > { %v535_v41 = vadd.f32 %v533_v39, %v528_v38 }
  0x3d   : > { %v646_v43 = vrot.slane %v535_v41, %v645_v42 }
 0x103   : > { %v414_v11 = vpop.f32.mrb[0].mxu0 }
 0x104   : > { %v415_v12 = vadd.f32 %v756_v10, %v414_v11  ;;  %v789_v13 = vpop.f32.mrb[1].mxu0 }
 0x106   : > { %v758_v14 = vmul.f32 -1.442695, %v415_v12 }
 0x108   : > { %859 = vpow2.f32 %v758_v14 }
 0x112   : > { %v860_v15 = vpop.eup %859 }
 0x113   : > { %v421_v16 = vadd.f32 1.0, %v860_v15 }
 0x115   : > { %861 = vrcp.f32 %v421_v16 }
 0x11f   : > { %v862_v17 = vpop.eup %861 }
 0x120   : > { %v424_v18 = vmul.f32 %v862_v17, %v415_v12 }
 0x122   : > { %793 = vmatmul.mubr.msk.f32.vlgmr.msra.gmra.mrb[0].mxu1 %vm433_vm3, %v424_v18 }
 0x123   : > { %797 = vmatprep.mubr.msk.f32.mxu1 %vm948_vm0, %v949_v6  ;;  %796 = vmatpush3.msra.mxu1 %v536_v19 }
 0x1f5   : > { %v507_v21 = vpop.f32.mrb[0].mxu1 }
 0x1f6   : > { %v794_v22 = vpop.f32.mrb[1].mxu1  ;;  %v508_v23 = vadd.f32 %v759_v20, %v507_v21 }
 0x1f8   : > { %537 = vxpose.xlu0.b32.start.end [1/1] (short) (narrow) %v508_v23, 8 }
 0x278   : > { %v553_v24 = vpop.trf.xlu0 }
 0x279   : > { %798 = vmatmul.mubr.msk.f32.vlgmr.msra.gmra.mrb[2].mxu1 %vm569_vm4, %v553_v24 }
 0x34c   : > { %v639_v44 = vpop.f32.mrb[2].mxu1 }
 0x34d   : > { %v647_v45 = vmul.f32 %v646_v43, %v639_v44  ;;  %v799_v46 = vpop.f32.mrb[3].mxu1 }
 0x34f   : > { %649 = vst.msk [vmem:[%s323_s13] sm:$0xf] %vm648_vm5, %v647_v45 }
 0x350   : > { %891 = shalt.err (!%p888_p2)
}
 0x351   : > { %s892_s26 = scalar_lea.hbm %s1106_s21, 64  ;;  %s896_s12 = scalar_lea.hbm %s1156_s8, 128 }
 0x352   : > { %p893_p3 = scmp.ne.s32.totalorder %s1106_s21, %s892_s26  ;;  %p897_p8 = scmp.lt.u32.totalorder %s1106_s21, %s1156_s8 }
 0x353   : > { %p898_p9 = scmp.lt.u32.totalorder %s896_s12, %s892_s26  ;;  %p900_p11 = scmp.lt.u32.totalorder %s892_s26, %s1106_s21 }
 0x354   : > { %p894_p4 = pnand %p893_p3, %p1034_p5 }
 0x355   : > { %p899_p10 = por %p898_p9, %p897_p8 }
 0x356   : > { %p895_p7 = pneg %p894_p4 }
 0x357   : > { %p901_p12 = por %p900_p11, %p899_p10 }
 0x359   : > { %p902_p13 = pnand %p901_p12, %p895_p7 }
 0x35b   : > { %905 = shalt.err (!%p902_p13)
}
 0x35c   : > { %810 = dma.vmem_to_hbm [thread:$0]  (%p1034_p5), %s1108_s17, 64, %s1106_s21, %s651_s22  }
 0x35d PF: > { %p822_p0 = scmp.ge.s32.totalorder %s944_s30, 2  ;;  %s676_s20 = sand.u32 1, %s932_s27  }
 0x35e   : > { %s677_s23 = scalar_lea.sflag [#allocation3], %s676_s20 }
 0x35f   : > { %p817_p1 = pnand %p822_p0, %p1038_p6 }
 0x361   : > { %927 = dma.done.wait (!%p817_p1), %s677_s23, 64  }
 0x362   : > { %929 = vsyncadd (!%p817_p1), %s677_s23, 4294967232  ;;  %p19_p2 = scmp.ge.s32.totalorder %s1021_s11, 4   ;;  %s1160_s27 = smov %s936_s28 }
 0x363   : > { %s1161_s28 = smov %s940_s29  ;;  %s1162_s29 = smov %s1032_s14 }
 0x364   : > { %s1163_s30 = smov %s1021_s11  ;;  %21 = sbr.rel (!%p19_p2) target bundleno = 4 (0x4), region = 95 }
 0x36b   :  { %682 = vsyncpa [#allocation3], 1 }
 0x36c   :  { %684 = vsyncpa [#allocation3 + $0x1], 1 }
 0x36d   :  { %685 = vsyncpa [#allocation4], 1 }
 0x36e   :  { %687 = vsyncpa [#allocation4 + $0x1], 1 }

</bundles_post_ra>
